<compile_context>
chip_gen: v7x
topology: tpu7x:2x2x1
jax: 0.10.0
libtpu: 0.0.40
codegen_flags: <defaults>
</compile_context>

<pallas_src>
import jax
import jax.numpy as jnp
from jax.experimental import pallas as pl
from jax.experimental.pallas import tpu as pltpu

N_EMBD = 64
HIDDEN = 4 * N_EMBD  # 256
PACK = 2             # original rows packed per 128-lane slab row


def ffw_kernel(x_ref, w1_ref, b1_ref, w2_ref, b2_ref, o_ref):
    # x_ref : (bm, 128) packed row tile (2 original 64-wide rows per row).
    # w1_ref: (128, 512) bf16 block-diag(w1, w1);  b1_ref: (1, 512) f32.
    # w2_ref: (512, 128) bf16 block-diag(w2, w2);  b2_ref: (1, 128) f32.
    xb = x_ref[...].astype(jnp.bfloat16)                                # bf16 MXU operand
    h = jnp.dot(xb, w1_ref[...], preferred_element_type=jnp.float32)    # (bm, 512) f32 acc
    h = jnp.maximum(h + b1_ref[...], 0.0)                               # bias + ReLU in f32
    y = jnp.dot(h.astype(jnp.bfloat16), w2_ref[...],
                preferred_element_type=jnp.float32)                     # (bm, 128) f32 acc
    y = y + b2_ref[...]
    # Dropout(p=0.0) -> identity.
    o_ref[...] = y.astype(o_ref.dtype)


def _block_diag2(w):
    z = jnp.zeros_like(w)
    top = jnp.concatenate([w, z], axis=1)
    bot = jnp.concatenate([z, w], axis=1)
    return jnp.concatenate([top, bot], axis=0)


def _pack_params(params):
    w1, b1, w2, b2 = params
    w1p = _block_diag2(w1).astype(jnp.bfloat16)                 # (128, 512)
    w2p = _block_diag2(w2).astype(jnp.bfloat16)                 # (512, 128)
    b1p = jnp.concatenate([b1, b1], axis=-1).astype(jnp.float32)  # (1, 512)
    b2p = jnp.concatenate([b2, b2], axis=-1).astype(jnp.float32)  # (1, 128)
    return w1p, b1p, w2p, b2p


def _pick_row_tile(np_rows):
    # Largest tile that still yields a grid of >= 2 steps (pipelining +
    # v7x dual-TensorCore sharding).  Tiny problems fall back to one 8-row
    # (sublane-aligned) tile.
    for c in (2048, 1024, 512, 256, 128, 64, 32, 16, 8):
        if np_rows >= 2 * c:
            return c
    return 8


def feed_forward(x, params):
    """x: [..., 64] (any leading dims).  Returns the same shape/dtype."""
    w1, b1, w2, b2 = params
    c_in = w1.shape[0]
    c_out = w2.shape[1]
    assert x.shape[-1] == c_in and c_in == c_out

    w1p, b1p, w2p, b2p = _pack_params(params)

    lead_shape = x.shape[:-1]
    x2 = x.reshape(-1, c_in)                      # (N, 64)
    n_rows = x2.shape[0]

    np_rows = -(-n_rows // PACK)                  # packed rows needed
    bm = _pick_row_tile(np_rows)
    np_pad = -(-np_rows // bm) * bm               # pad to a tile multiple
    n_pad = np_pad * PACK
    if n_pad != n_rows:
        x2 = jnp.pad(x2, ((0, n_pad - n_rows), (0, 0)))

    lane = PACK * c_in                            # 128
    xp = x2.reshape(np_pad, lane)                 # lane-dense (Np, 128) slab
    grid = (np_pad // bm,)

    out = pl.pallas_call(
        ffw_kernel,
        out_shape=jax.ShapeDtypeStruct((np_pad, lane), x.dtype),
        grid=grid,
        in_specs=[
            pl.BlockSpec((bm, lane), lambda i: (i, 0)),
            pl.BlockSpec(w1p.shape, lambda i: (0, 0)),   # VMEM-resident weights
            pl.BlockSpec(b1p.shape, lambda i: (0, 0)),
            pl.BlockSpec(w2p.shape, lambda i: (0, 0)),
            pl.BlockSpec(b2p.shape, lambda i: (0, 0)),
        ],
        out_specs=pl.BlockSpec((bm, lane), lambda i: (i, 0)),
        compiler_params=pltpu.CompilerParams(
            dimension_semantics=("parallel",)),
    )(xp, w1p, b1p, w2p, b2p)

    out = out.reshape(n_pad, c_out)[:n_rows]      # un-pack + drop pad rows
    return out.reshape(*lead_shape, c_out)


def init_params(key):
    k1, k2, k3, k4 = jax.random.split(key, 4)
    scale = 0.02
    w1 = scale * jax.random.normal(k1, (N_EMBD, HIDDEN), jnp.float32)
    b1 = scale * jax.random.normal(k2, (1, HIDDEN), jnp.float32)
    w2 = scale * jax.random.normal(k3, (HIDDEN, N_EMBD), jnp.float32)
    b2 = scale * jax.random.normal(k4, (1, N_EMBD), jnp.float32)
    return (w1, b1, w2, b2)


def reference_ffw(x, params):
    """Pure-JAX f32 reference: nn.Linear -> ReLU -> nn.Linear -> Dropout(0)."""
    w1, b1, w2, b2 = params
    h = jnp.maximum(x @ w1 + b1, 0.0)
    return h @ w2 + b2


if __name__ == "__main__":
    key = jax.random.PRNGKey(0)
    kx1, kx2, kx3, kp = jax.random.split(key, 4)
    params = init_params(kp)

    # Small shape consistent with the module (batch=2, seq=8, n_embd=64):
    # N = 16 rows -> 8 packed rows -> single 8-row tile.
    x_small = jax.random.normal(kx1, (2, 8, N_EMBD), jnp.float32)
    out_small = jax.block_until_ready(feed_forward(x_small, params))
    ref_small = reference_ffw(x_small, params)
    assert out_small.shape == x_small.shape
    assert jnp.allclose(out_small, ref_small, atol=1e-2, rtol=1e-2)

    # Ragged N (15 rows, odd) exercises the pad-then-slice path.
    x_rag = jax.random.normal(kx2, (3, 5, N_EMBD), jnp.float32)
    out_rag = jax.block_until_ready(feed_forward(x_rag, params))
    ref_rag = reference_ffw(x_rag, params)
    assert out_rag.shape == x_rag.shape
    assert jnp.allclose(out_rag, ref_rag, atol=1e-2, rtol=1e-2)

    # N = 256 rows -> 128 packed rows -> grid of 2 x 64-row tiles
    # (both TensorCores used on v7x, pipelined on v5e/v6e).
    x_big = jax.random.normal(kx3, (4, 64, N_EMBD), jnp.float32)
    out_big = jax.block_until_ready(feed_forward(x_big, params))
    ref_big = reference_ffw(x_big, params)
    assert out_big.shape == x_big.shape
    assert jnp.allclose(out_big, ref_big, atol=1e-2, rtol=1e-2)

    print("KERNEL_OK")
</pallas_src>

<mosaic_0001>
module attributes {stable_mosaic.version = 11 : i64} {
  func.func @ffw_kernel(%arg0: i32, %arg1: memref<8x128xf32, #tpu.memory_space<vmem>>, %arg2: memref<128x512xbf16, #tpu.memory_space<vmem>>, %arg3: memref<1x512xf32, #tpu.memory_space<vmem>>, %arg4: memref<512x128xbf16, #tpu.memory_space<vmem>>, %arg5: memref<1x128xf32, #tpu.memory_space<vmem>>, %arg6: memref<8x128xf32, #tpu.memory_space<vmem>>) attributes {dimension_semantics = [#tpu.dimension_semantics<parallel>], iteration_bounds = array<i64: 1>, scalar_prefetch = 0 : i64, scratch_operands = 0 : i64, tpu.core_type = #tpu.core_type<tc>, window_params = [{transform_indices = @transform_0, window_bounds = array<i64: 8, 128>}, {pipeline_mode = #tpu.pipeline_mode<synchronous>, transform_indices = @transform_1, window_bounds = array<i64: 128, 512>}, {pipeline_mode = #tpu.pipeline_mode<synchronous>, transform_indices = @transform_2, window_bounds = array<i64: 1, 512>}, {pipeline_mode = #tpu.pipeline_mode<synchronous>, transform_indices = @transform_3, window_bounds = array<i64: 512, 128>}, {pipeline_mode = #tpu.pipeline_mode<synchronous>, transform_indices = @transform_4, window_bounds = array<i64: 1, 128>}, {transform_indices = @transform_5, window_bounds = array<i64: 8, 128>}]} {
    %c0 = arith.constant 0 : index
    %c0_0 = arith.constant 0 : index
    %0 = vector.load %arg1[%c0, %c0_0] : memref<8x128xf32, #tpu.memory_space<vmem>>, vector<8x128xf32>
    %1 = arith.truncf %0 : vector<8x128xf32> to vector<8x128xbf16>
    %c0_1 = arith.constant 0 : index
    %c0_2 = arith.constant 0 : index
    %2 = vector.load %arg2[%c0_1, %c0_2] : memref<128x512xbf16, #tpu.memory_space<vmem>>, vector<128x512xbf16>
    %cst = arith.constant dense<0.000000e+00> : vector<8x512xf32>
    %3 = tpu.matmul %1, %2, %cst {dimension_numbers = #tpu.dot_dimension_numbers<[1], [0], [0], [1], [0, 0, 1, 1], [], []>} : vector<8x128xbf16>, vector<128x512xbf16>, vector<8x512xf32> -> vector<8x512xf32>
    %c0_3 = arith.constant 0 : index
    %c0_4 = arith.constant 0 : index
    %4 = vector.load %arg3[%c0_3, %c0_4] : memref<1x512xf32, #tpu.memory_space<vmem>>, vector<1x512xf32>
    %5 = vector.broadcast %4 : vector<1x512xf32> to vector<8x512xf32>
    %6 = arith.addf %3, %5 : vector<8x512xf32>
    %cst_5 = arith.constant 0.000000e+00 : f32
    %7 = vector.broadcast %cst_5 : f32 to vector<8x512xf32>
    %8 = arith.maximumf %6, %7 : vector<8x512xf32>
    %9 = arith.truncf %8 : vector<8x512xf32> to vector<8x512xbf16>
    %c0_6 = arith.constant 0 : index
    %c0_7 = arith.constant 0 : index
    %10 = vector.load %arg4[%c0_6, %c0_7] : memref<512x128xbf16, #tpu.memory_space<vmem>>, vector<512x128xbf16>
    %cst_8 = arith.constant dense<0.000000e+00> : vector<8x128xf32>
    %11 = tpu.matmul %9, %10, %cst_8 {dimension_numbers = #tpu.dot_dimension_numbers<[1], [0], [0], [1], [0, 0, 1, 1], [], []>} : vector<8x512xbf16>, vector<512x128xbf16>, vector<8x128xf32> -> vector<8x128xf32>
    %c0_9 = arith.constant 0 : index
    %c0_10 = arith.constant 0 : index
    %12 = vector.load %arg5[%c0_9, %c0_10] : memref<1x128xf32, #tpu.memory_space<vmem>>, vector<1x128xf32>
    %13 = vector.broadcast %12 : vector<1x128xf32> to vector<8x128xf32>
    %14 = arith.addf %11, %13 : vector<8x128xf32>
    %c0_11 = arith.constant 0 : index
    %c0_12 = arith.constant 0 : index
    %15 = vector.load %arg6[%c0_11, %c0_12] : memref<8x128xf32, #tpu.memory_space<vmem>>, vector<8x128xf32>
    tpu.vector_store %arg6[%c0_11, %c0_12], %14 {strides = array<i32>} : memref<8x128xf32, #tpu.memory_space<vmem>>, vector<8x128xf32>,
    return
  }
  func.func @transform_0(%arg0: i32) -> (i32, i32) {
    %c0_i32 = arith.constant 0 : i32
    %c0_i32_0 = arith.constant 0 : i32
    return %arg0, %c0_i32 : i32, i32
  }
  func.func @transform_1(%arg0: i32) -> (i32, i32) {
    %c0_i32 = arith.constant 0 : i32
    %c0_i32_0 = arith.constant 0 : i32
    %c0_i32_1 = arith.constant 0 : i32
    return %c0_i32, %c0_i32_0 : i32, i32
  }
  func.func @transform_2(%arg0: i32) -> (i32, i32) {
    %c0_i32 = arith.constant 0 : i32
    %c0_i32_0 = arith.constant 0 : i32
    %c0_i32_1 = arith.constant 0 : i32
    return %c0_i32, %c0_i32_0 : i32, i32
  }
  func.func @transform_3(%arg0: i32) -> (i32, i32) {
    %c0_i32 = arith.constant 0 : i32
    %c0_i32_0 = arith.constant 0 : i32
    %c0_i32_1 = arith.constant 0 : i32
    return %c0_i32, %c0_i32_0 : i32, i32
  }
  func.func @transform_4(%arg0: i32) -> (i32, i32) {
    %c0_i32 = arith.constant 0 : i32
    %c0_i32_0 = arith.constant 0 : i32
    %c0_i32_1 = arith.constant 0 : i32
    return %c0_i32, %c0_i32_0 : i32, i32
  }
  func.func @transform_5(%arg0: i32) -> (i32, i32) {
    %c0_i32 = arith.constant 0 : i32
    %c0_i32_0 = arith.constant 0 : i32
    return %arg0, %c0_i32 : i32, i32
  }
}

</mosaic_0001>

<bundles_post_ra>
// kernel: tpu_custom_call.1
= control target key start
LH: loop header
LB: loop body
LE: loop exit
PB: predicated region body
PF: predicated region fallthrough
CT: control target
= control target key end

     0   :  { %10 = vsyncpa [#allocation3], 0  ;;  %s1112_s0 = inlined_call_operand.hbm [shape: f32[8,128], index: 0, kind: input, shape index: {}]   ;;  %s1113_s1 = inlined_call_operand.hbm [shape: bf16[128,512], index: 1, kind: input, shape index: {}]   ;;  %s1114_s2 = inlined_call_operand.vmem [shape: f32[1,512], index: 2, kind: input, shape index: {}]   ;;  %s1115_s3 = inlined_call_operand.hbm [shape: bf16[512,128], index: 3, kind: input, shape index: {}]   ;;  %s1116_s4 = inlined_call_operand.vmem [shape: f32[1,128], index: 4, kind: input, shape index: {}]   ;;  %s1117_s5 = inlined_call_operand.hbm [shape: f32[8,128], index: 5, kind: output, shape index: {}]  }
   0x1   :  { %11 = vsyncpa [#allocation6], 0 }
   0x2   :  { %12 = vsyncpa [#allocation4], 0  ;;  %s1019_s18 = smov [#allocation5]   ;;  %s925_s22 = scalar_lea.hbm %s1113_s1, 4096 }
   0x3   :  { %s28_s19 = sshll.u32 %s1019_s18, 4  ;;  %p926_p0 = scmp.ne.s32.totalorder %s1113_s1, %s925_s22  ;;  %s29_s19 = int_to_ptr.vmem [resolvable:$true] %s28_s19 }
   0x4   :  { %p929_p1 = scmp.lt.u32.totalorder %s925_s22, %s1113_s1 }
   0x6   :  { %p931_p2 = pnand %p929_p1, %p926_p0 }
   0x8   :  { %934 = shalt.err (!%p931_p2)
}
   0x9   :  { %s935_s27 = scalar_lea.vmem %s29_s19, 4096  ;;  %p940_p4 = scmp.lt.s32.totalorder %s29_s19, %s29_s19 }
   0xa   :  { %p936_p3 = scmp.ne.s32.totalorder %s29_s19, %s935_s27  ;;  %p941_p5 = scmp.lt.s32.totalorder %s935_s27, %s935_s27 }
   0xc   :  { %p942_p6 = por %p941_p5, %p940_p4 }
   0xe   :  { %p943_p7 = pnand %p942_p6, %p936_p3 }
  0x10   :  { %946 = shalt.err (!%p943_p7)
}
  0x11   :  { %s1020_s28 = smov 256   ;;  %s1021_s29 = smov 16  }
  0x12   :  { %34 = dma.hbm_to_vmem [thread:$0]  %s1113_s1, 4096, %s29_s19, [#allocation6], %s1020_s28, %s1020_s28, %s1021_s29  }
  0x13   :  { %s1022_s7 = smov [#allocation2]   ;;  %s1023_s9 = smov [#allocation7]  }
  0x14   :  { %s19_s8 = sshll.u32 %s1022_s7, 4  ;;  %s42_s10 = sshll.u32 %s1023_s9, 4  ;;  %s20_s8 = int_to_ptr.vmem [resolvable:$true] %s19_s8  ;;  %s43_s10 = int_to_ptr.vmem [resolvable:$true] %s42_s10 }
  0x15   :  { %s947_s13 = scalar_lea.hbm %s1112_s0, 128 }
  0x16   :  { %p948_p8 = scmp.ne.s32.totalorder %s1112_s0, %s947_s13  ;;  %p951_p9 = scmp.lt.u32.totalorder %s947_s13, %s1112_s0 }
  0x18   :  { %p953_p10 = pnand %p951_p9, %p948_p8 }
  0x1a   :  { %956 = shalt.err (!%p953_p10)
}
  0x1b   :  { %s957_s1 = scalar_lea.vmem %s20_s8, 128  ;;  %p962_p12 = scmp.lt.s32.totalorder %s20_s8, %s20_s8 }
  0x1c   :  { %p958_p11 = scmp.ne.s32.totalorder %s20_s8, %s957_s1  ;;  %p963_p13 = scmp.lt.s32.totalorder %s957_s1, %s957_s1 }
  0x1e   :  { %p964_p0 = por %p963_p13, %p962_p12 }
  0x20   :  { %p965_p1 = pnand %p964_p0, %p958_p11 }
  0x22   :  { %968 = shalt.err (!%p965_p1)
}
  0x23   :  { %22 = dma.hbm_to_vmem [thread:$0]  %s1112_s0, 128, %s20_s8, [#allocation3]  }
  0x24   :  { %s969_s22 = scalar_lea.hbm %s1115_s3, 4096 }
  0x25   :  { %p970_p2 = scmp.ne.s32.totalorder %s1115_s3, %s969_s22  ;;  %p973_p3 = scmp.lt.u32.totalorder %s969_s22, %s1115_s3 }
  0x27   :  { %p975_p4 = pnand %p973_p3, %p970_p2 }
  0x29   :  { %978 = shalt.err (!%p975_p4)
}
  0x2a   :  { %s979_s27 = scalar_lea.vmem %s43_s10, 4096  ;;  %p984_p6 = scmp.lt.s32.totalorder %s43_s10, %s43_s10 }
  0x2b   :  { %p980_p5 = scmp.ne.s32.totalorder %s43_s10, %s979_s27  ;;  %p985_p7 = scmp.lt.s32.totalorder %s979_s27, %s979_s27 }
  0x2d   :  { %p986_p8 = por %p985_p7, %p984_p6 }
  0x2f   :  { %p987_p9 = pnand %p986_p8, %p980_p5 }
  0x31   :  { %990 = shalt.err (!%p987_p9)
}
  0x32   :  { %s1024_s0 = smov 64   ;;  %s1025_s28 = smov 4  }
  0x33   :  { %48 = dma.hbm_to_vmem [thread:$0]  %s1115_s3, 4096, %s43_s10, [#allocation6], %s1024_s0, %s1024_s0, %s1025_s28  }
  0x34   :  { %1013 = dma.done.wait [#allocation3], 128  }
  0x35   :  { %1014 = vsyncadd [#allocation3], 4294967168 }
  0x36   :  { %1015 = dma.done.wait [#allocation6], 8192  }
  0x37   :  { %1016 = vsyncadd [#allocation6], 4294959104  ;;  %v1026_v0 = vmov 0   ;;  %v845_v1 = vld [vmem:[#allocation5 + $0x4] ss:$16 sps:$4 sm:$0xff]   ;;  %v61_v33 = vld [vmem:[#allocation2] sm:$0xff] }
  0x38   :  { %309 = vmatprep.mubr.bf16.mxu0 %v1026_v0  ;;  %350 = vmatprep.mubr.bf16.mxu1 %v1026_v0  ;;  %v847_v2 = vld [vmem:[#allocation5 + $0xc] ss:$16 sps:$4 sm:$0xff]   ;;  %v849_v3 = vld [vmem:[#allocation5] ss:$16 sps:$4 sm:$0xff]   ;;  %v850_v4 = vld [vmem:[#allocation5 + $0x8] ss:$16 sps:$4 sm:$0xff]   ;;  %v62_v37 = vpack.c.bf16 %v61_v33, %v61_v33 }
  0x39   :  { %277 = vmatprep.subr.bf16.mxu0 %v845_v1  ;;  %318 = vmatprep.subr.bf16.mxu1 %v847_v2  ;;  %v851_v5 = vld [vmem:[#allocation5 + $0x24] ss:$16 sps:$4 sm:$0xff]   ;;  %v853_v6 = vld [vmem:[#allocation5 + $0x2c] ss:$16 sps:$4 sm:$0xff]   ;;  %v855_v7 = vld [vmem:[#allocation5 + $0x20] ss:$16 sps:$4 sm:$0xff]  }
  0x3a   :  { %278 = vmatpush1.bf16.msra.mxu0 %v849_v3  ;;  %319 = vmatpush1.bf16.msra.mxu1 %v850_v4  ;;  %v856_v8 = vld [vmem:[#allocation5 + $0x28] ss:$16 sps:$4 sm:$0xff]   ;;  %v857_v9 = vld [vmem:[#allocation5 + $0x44] ss:$16 sps:$4 sm:$0xff]   ;;  %v859_v10 = vld [vmem:[#allocation5 + $0x4c] ss:$16 sps:$4 sm:$0xff]   ;;  %v97_v3 = vlaneseq }
  0x3b   :  { %279 = vmatprep.subr.bf16.mxu0 %v851_v5  ;;  %320 = vmatprep.subr.bf16.mxu1 %v853_v6  ;;  %v861_v11 = vld [vmem:[#allocation5 + $0x40] ss:$16 sps:$4 sm:$0xff]   ;;  %v862_v12 = vld [vmem:[#allocation5 + $0x48] ss:$16 sps:$4 sm:$0xff]   ;;  %v863_v13 = vld [vmem:[#allocation5 + $0x64] ss:$16 sps:$4 sm:$0xff]  }
  0x3c   :  { %v865_v14 = vld [vmem:[#allocation5 + $0x6c] ss:$16 sps:$4 sm:$0xff]   ;;  %v867_v15 = vld [vmem:[#allocation5 + $0x60] ss:$16 sps:$4 sm:$0xff]   ;;  %v868_v16 = vld [vmem:[#allocation5 + $0x68] ss:$16 sps:$4 sm:$0xff]  }
  0x3d   :  { %v869_v17 = vld [vmem:[#allocation5 + $0x84] ss:$16 sps:$4 sm:$0xff]   ;;  %v871_v18 = vld [vmem:[#allocation5 + $0x8c] ss:$16 sps:$4 sm:$0xff]   ;;  %v873_v19 = vld [vmem:[#allocation5 + $0x80] ss:$16 sps:$4 sm:$0xff]  }
  0x3e   :  { %280 = vmatpush1.bf16.msra.mxu0 %v855_v7  ;;  %321 = vmatpush1.bf16.msra.mxu1 %v856_v8  ;;  %v874_v20 = vld [vmem:[#allocation5 + $0x88] ss:$16 sps:$4 sm:$0xff]   ;;  %v875_v21 = vld [vmem:[#allocation5 + $0xa4] ss:$16 sps:$4 sm:$0xff]   ;;  %v877_v22 = vld [vmem:[#allocation5 + $0xac] ss:$16 sps:$4 sm:$0xff]  }
  0x3f   :  { %281 = vmatprep.subr.bf16.mxu0 %v857_v9  ;;  %322 = vmatprep.subr.bf16.mxu1 %v859_v10  ;;  %v879_v23 = vld [vmem:[#allocation5 + $0xa0] ss:$16 sps:$4 sm:$0xff]   ;;  %v880_v24 = vld [vmem:[#allocation5 + $0xa8] ss:$16 sps:$4 sm:$0xff]   ;;  %v881_v25 = vld [vmem:[#allocation5 + $0xc4] ss:$16 sps:$4 sm:$0xff]  }
  0x40   :  { %v883_v26 = vld [vmem:[#allocation5 + $0xcc] ss:$16 sps:$4 sm:$0xff]   ;;  %v885_v27 = vld [vmem:[#allocation5 + $0xc0] ss:$16 sps:$4 sm:$0xff]   ;;  %v886_v28 = vld [vmem:[#allocation5 + $0xc8] ss:$16 sps:$4 sm:$0xff]  }
  0x41   :  { %v887_v29 = vld [vmem:[#allocation5 + $0xe4] ss:$16 sps:$4 sm:$0xff]   ;;  %v889_v30 = vld [vmem:[#allocation5 + $0xec] ss:$16 sps:$4 sm:$0xff]   ;;  %v891_v31 = vld [vmem:[#allocation5 + $0xe0] ss:$16 sps:$4 sm:$0xff]  }
  0x42   :  { %282 = vmatpush1.bf16.msra.mxu0 %v861_v11  ;;  %323 = vmatpush1.bf16.msra.mxu1 %v862_v12  ;;  %v892_v32 = vld [vmem:[#allocation5 + $0xe8] ss:$16 sps:$4 sm:$0xff]   ;;  %v893_v34 = vld [vmem:[#allocation7 + $0x40] sm:$0xff]   ;;  %v901_v43 = vld [vmem:[#allocation7 + $0x50] sm:$0xff]   ;;  %v98_v4 = vshrl.u32 %v97_v3, 7  ;;  %s1027_s8 = smov [#allocation8]  }
  0x43   :  { %283 = vmatprep.subr.bf16.mxu0 %v863_v13  ;;  %324 = vmatprep.subr.bf16.mxu1 %v865_v14  ;;  %v894_v35 = vld [vmem:[#allocation7 + $0xc0] sm:$0xff]   ;;  %v897_v39 = vld [vmem:[#allocation7 + $0x48] sm:$0xff]   ;;  %v902_v44 = vld [vmem:[#allocation7 + $0xd0] sm:$0xff]   ;;  %s717_s9 = sshll.u32 %s1027_s8, 4  ;;  %s718_s9 = int_to_ptr.vmem [resolvable:$true] %s717_s9 }
  0x44   :  { %v895_v36 = vld [vmem:[#allocation7] sm:$0xff]   ;;  %v898_v40 = vld [vmem:[#allocation7 + $0xc8] sm:$0xff]   ;;  %v903_v45 = vld [vmem:[#allocation7 + $0x10] sm:$0xff]   ;;  %v99_v5 = vsub.s32 0, %v98_v4  ;;  %v107_v6 = vsub.s32 2, %v98_v4  ;;  %v103_v8 = vsub.s32 1, %v98_v4  ;;  %p996_p11 = scmp.lt.s32.totalorder %s718_s9, %s718_s9 }
  0x45   :  { %v896_v38 = vld [vmem:[#allocation7 + $0x80] sm:$0xff]   ;;  %v899_v41 = vld [vmem:[#allocation7 + $0x8] sm:$0xff]   ;;  %v904_v46 = vld [vmem:[#allocation7 + $0x90] sm:$0xff]   ;;  %v111_v9 = vsub.s32 3, %v98_v4  ;;  %s991_s10 = scalar_lea.vmem %s718_s9, 128 }
  0x46   :  { %284 = vmatpush1.bf16.msra.mxu0 %v867_v15  ;;  %325 = vmatpush1.bf16.msra.mxu1 %v868_v16  ;;  %v900_v42 = vld [vmem:[#allocation7 + $0x88] sm:$0xff]   ;;  %v905_v47 = vld [vmem:[#allocation7 + $0x58] sm:$0xff]   ;;  %v909_v51 = vld [vmem:[#allocation7 + $0x60] sm:$0xff]   ;;  %p992_p10 = scmp.ne.s32.totalorder %s718_s9, %s991_s10  ;;  %p997_p12 = scmp.lt.s32.totalorder %s991_s10, %s991_s10 }
  0x47   :  { %285 = vmatprep.subr.bf16.mxu0 %v869_v17  ;;  %326 = vmatprep.subr.bf16.mxu1 %v871_v18  ;;  %v906_v48 = vld [vmem:[#allocation7 + $0xd8] sm:$0xff]   ;;  %v910_v52 = vld [vmem:[#allocation7 + $0xe0] sm:$0xff]   ;;  %v913_v55 = vld [vmem:[#allocation7 + $0x68] sm:$0xff]  }
  0x48   :  { %v907_v49 = vld [vmem:[#allocation7 + $0x18] sm:$0xff]   ;;  %v911_v53 = vld [vmem:[#allocation7 + $0x20] sm:$0xff]   ;;  %v914_v56 = vld [vmem:[#allocation7 + $0xe8] sm:$0xff]   ;;  %p998_p13 = por %p997_p12, %p996_p11 }
  0x49   :  { %v908_v50 = vld [vmem:[#allocation7 + $0x98] sm:$0xff]   ;;  %v912_v54 = vld [vmem:[#allocation7 + $0xa0] sm:$0xff]   ;;  %v915_v57 = vld [vmem:[#allocation7 + $0x28] sm:$0xff]  }
  0x4a   :  { %286 = vmatpush1.bf16.msra.mxu0 %v873_v19  ;;  %327 = vmatpush1.bf16.msra.mxu1 %v874_v20  ;;  %v916_v58 = vld [vmem:[#allocation7 + $0xa8] sm:$0xff]   ;;  %v917_v59 = vld [vmem:[#allocation7 + $0x70] sm:$0xff]   ;;  %v921_v63 = vld [vmem:[#allocation7 + $0x78] sm:$0xff]   ;;  %p999_p0 = pnand %p998_p13, %p992_p10 }
  0x4b   :  { %287 = vmatprep.subr.bf16.mxu0 %v875_v21  ;;  %328 = vmatprep.subr.bf16.mxu1 %v877_v22  ;;  %v918_v60 = vld [vmem:[#allocation7 + $0xf0] sm:$0xff]   ;;  %v922_v0 = vld [vmem:[#allocation7 + $0xf8] sm:$0xff]  }
  0x4c   :  { %v919_v61 = vld [vmem:[#allocation7 + $0x30] sm:$0xff]   ;;  %v923_v1 = vld [vmem:[#allocation7 + $0x38] sm:$0xff]  }
  0x4d   :  { %v920_v62 = vld [vmem:[#allocation7 + $0xb0] sm:$0xff]   ;;  %v924_v2 = vld [vmem:[#allocation7 + $0xb8] sm:$0xff]  }
  0x4e   :  { %288 = vmatpush1.bf16.msra.mxu0 %v879_v23  ;;  %329 = vmatpush1.bf16.msra.mxu1 %v880_v24  ;;  %v95_v7 = vld [vmem:[%s1114_s2] sm:$0xf] }
  0x4f   :  { %289 = vmatprep.subr.bf16.mxu0 %v881_v25  ;;  %330 = vmatprep.subr.bf16.mxu1 %v883_v26  ;;  %v100_v10 = vrot.slane %v95_v7, %v99_v5  ;;  %v108_v11 = vrot.slane %v95_v7, %v107_v6  ;;  %v104_v12 = vrot.slane %v95_v7, %v103_v8 }
  0x50   :  { %v112_v13 = vrot.slane %v95_v7, %v111_v9 }
  0x52   :  { %290 = vmatpush1.bf16.msra.mxu0 %v885_v27  ;;  %331 = vmatpush1.bf16.msra.mxu1 %v886_v28 }
  0x53   :  { %291 = vmatprep.subr.bf16.mxu0 %v887_v29  ;;  %332 = vmatprep.subr.bf16.mxu1 %v889_v30 }
  0x56   :  { %292 = vmatpush1.bf16.msra.mxu0 %v891_v31  ;;  %333 = vmatpush1.bf16.msra.mxu1 %v892_v32 }
  0x57   :  { %792 = vmatprep.subr.bf16.mxu0 %v893_v34  ;;  %814 = vmatprep.subr.bf16.mxu1 %v894_v35 }
  0x59   :  { %310 = vmatmul.mubr.bf16.vlgmr.msra.gmra.mrb[0].mxu0 %v62_v37  ;;  %351 = vmatmul.mubr.bf16.vlgmr.msra.gmra.mrb[0].mxu1 %v62_v37 }
  0x5a   :  { %793 = vmatpush3.bf16.msra.mxu0 %v895_v36  ;;  %815 = vmatpush3.bf16.msra.mxu1 %v896_v38  ;;  %v759_v36 = vld [vmem:[%s1116_s4] ss:$0 sm:$0xff] }
  0x5b   :  { %794 = vmatprep.subr.bf16.mxu0 %v897_v39  ;;  %816 = vmatprep.subr.bf16.mxu1 %v898_v40 }
  0x5e   :  { %795 = vmatpush3.bf16.msra.mxu0 %v899_v41  ;;  %817 = vmatpush3.bf16.msra.mxu1 %v900_v42 }
  0x5f   :  { %796 = vmatprep.subr.bf16.mxu0 %v901_v43  ;;  %818 = vmatprep.subr.bf16.mxu1 %v902_v44 }
  0x62   :  { %797 = vmatpush3.bf16.msra.mxu0 %v903_v45  ;;  %819 = vmatpush3.bf16.msra.mxu1 %v904_v46 }
  0x63   :  { %798 = vmatprep.subr.bf16.mxu0 %v905_v47  ;;  %820 = vmatprep.subr.bf16.mxu1 %v906_v48 }
  0x66   :  { %799 = vmatpush3.bf16.msra.mxu0 %v907_v49  ;;  %821 = vmatpush3.bf16.msra.mxu1 %v908_v50 }
  0x67   :  { %800 = vmatprep.subr.bf16.mxu0 %v909_v51  ;;  %822 = vmatprep.subr.bf16.mxu1 %v910_v52 }
  0x6a   :  { %801 = vmatpush3.bf16.msra.mxu0 %v911_v53  ;;  %823 = vmatpush3.bf16.msra.mxu1 %v912_v54 }
  0x6b   :  { %802 = vmatprep.subr.bf16.mxu0 %v913_v55  ;;  %824 = vmatprep.subr.bf16.mxu1 %v914_v56 }
  0x6e   :  { %803 = vmatpush3.bf16.msra.mxu0 %v915_v57  ;;  %825 = vmatpush3.bf16.msra.mxu1 %v916_v58 }
  0x6f   :  { %804 = vmatprep.subr.bf16.mxu0 %v917_v59  ;;  %826 = vmatprep.subr.bf16.mxu1 %v918_v60 }
  0x72   :  { %805 = vmatpush3.bf16.msra.mxu0 %v919_v61  ;;  %827 = vmatpush3.bf16.msra.mxu1 %v920_v62 }
  0x73   :  { %806 = vmatprep.subr.bf16.mxu0 %v921_v63  ;;  %828 = vmatprep.subr.bf16.mxu1 %v922_v0 }
  0x76   :  { %807 = vmatpush3.bf16.msra.mxu0 %v923_v1  ;;  %829 = vmatpush3.bf16.msra.mxu1 %v924_v2 }
 0x12c   :  { %v311_v14 = vpop.f32.mrb[0].mxu0  ;;  %v352_v15 = vpop.f32.mrb[0].mxu1 }
 0x12d   :  { %v312_v16 = vadd.f32 %v311_v14, %v100_v10  ;;  %v353_v17 = vadd.f32 %v352_v15, %v108_v11  ;;  %v313_v18 = vpop.f32.mrb[1].mxu0  ;;  %v354_v19 = vpop.f32.mrb[1].mxu1 }
 0x12e   :  { %v314_v20 = vadd.f32 %v313_v18, %v104_v12  ;;  %v355_v21 = vadd.f32 %v354_v19, %v112_v13  ;;  %v315_v22 = vpop.f32.mrb[2].mxu0  ;;  %v356_v23 = vpop.f32.mrb[2].mxu1 }
 0x12f   :  { %v359_v24 = vmax.f32 %v312_v16, 0.0  ;;  %v361_v25 = vmax.f32 %v353_v17, 0.0  ;;  %v316_v26 = vpop.f32.mrb[3].mxu0  ;;  %v357_v27 = vpop.f32.mrb[3].mxu1 }
 0x130   :  { %v360_v28 = vmax.f32 %v314_v20, 0.0  ;;  %v362_v29 = vmax.f32 %v355_v21, 0.0 }
 0x131   :  { %v365_v30 = vpack.c.bf16 %v361_v25, %v361_v25  ;;  %v363_v33 = vpack.c.bf16 %v359_v24, %v359_v24 }
 0x132   :  { %v364_v31 = vpack.c.bf16 %v360_v28, %v360_v28  ;;  %v366_v32 = vpack.c.bf16 %v362_v29, %v362_v29 }
 0x134   :  { %662 = vmatprep.mubr.bf16.mxu0 %v364_v31  ;;  %702 = vmatprep.mubr.bf16.mxu1 %v366_v32 }
 0x135   :  { %663 = vmatmul.mubr.bf16.vlgmr.msra.gmra.mrb[4].mxu0 %v363_v33  ;;  %703 = vmatmul.mubr.bf16.vlgmr.msra.gmra.mrb[4].mxu1 %v365_v30 }
 0x208   :  { %v808_v34 = vpop.f32.mrb[4].mxu0  ;;  %v830_v35 = vpop.f32.mrb[4].mxu1 }
 0x209   :  { %v809_v37 = vpop.f32.mrb[5].mxu0  ;;  %v831_v38 = vpop.f32.mrb[5].mxu1 }
 0x20a   :  { %v810_v39 = vadd.f32 %v809_v37, %v808_v34  ;;  %v832_v40 = vadd.f32 %v831_v38, %v830_v35  ;;  %v811_v41 = vpop.f32.mrb[6].mxu0  ;;  %v833_v42 = vpop.f32.mrb[6].mxu1 }
 0x20b   :  { %v812_v43 = vpop.f32.mrb[7].mxu0  ;;  %v834_v44 = vpop.f32.mrb[7].mxu1 }
 0x20c   :  { %v665_v45 = vadd.f32 %v810_v39, %v759_v36 }
 0x20e   :  { %v705_v46 = vadd.f32 %v832_v40, %v665_v45 }
 0x210   :  { %710 = vst [vmem:[#allocation8] sm:$0xff] %v705_v46 }
 0x211   :  { %1002 = shalt.err (!%p999_p0)
}
 0x212   :  { %s1003_s12 = scalar_lea.hbm %s1117_s5, 128 }
 0x213   :  { %p1004_p1 = scmp.ne.s32.totalorder %s1117_s5, %s1003_s12  ;;  %p1007_p2 = scmp.lt.u32.totalorder %s1003_s12, %s1117_s5 }
 0x215   :  { %p1009_p3 = pnand %p1007_p2, %p1004_p1 }
 0x217   :  { %1012 = shalt.err (!%p1009_p3)
}
 0x218   :  { %720 = dma.vmem_to_hbm [thread:$0]  %s718_s9, 128, %s1117_s5, [#allocation4]  }
 0x219   :  { %1017 = dma.done.wait [#allocation4], 128  }
 0x21a   :  { %1018 = vsyncadd [#allocation4], 4294967168 }
 0x21b   :  { %724 = vsyncpa [#allocation3], 1 }
 0x21c   :  { %725 = vsyncpa [#allocation6], 1 }
 0x21d   :  { %726 = vsyncpa [#allocation4], 1 }

</bundles_post_ra>
